<compile_context>
chip_gen: v6e
topology: v6e:2x2x1
jax: 0.10.0
libtpu: 0.0.40
codegen_flags: <defaults>
</compile_context>

<pallas_src>
import functools

import jax
import jax.numpy as jnp
from jax.experimental import pallas as pl
from jax.experimental.pallas import tpu as pltpu

LANE = 128     # vreg lane width
SUBLANE = 8    # vreg sublane count


def _round_up(n, m):
    return ((n + m - 1) // m) * m


# ---------------------------------------------------------------------------
# PackedTensor analogue (the only thing DDP.forward actually inspects).
# ---------------------------------------------------------------------------
class PackedTensor:
    """Minimal stand-in for protsupport's PackedTensor: holds a `.tensor`."""

    def __init__(self, tensor):
        self.tensor = tensor


# ---------------------------------------------------------------------------
# Pallas kernel: fused 2-layer MLP  y = relu(x @ W1 + b1) @ W2 + b2
#   x tile: (TILE_B, Dp) bf16      W1: (Dp, Hp) bf16   b1: (1, Hp) f32
#   W2: (Hp, Op) bf16              b2: (1, Op) f32     out: (TILE_B, Op) f32
# bf16 operands feed the MXU at full rate; accumulation and all element-wise
# work (bias add, ReLU) stay in f32.
# ---------------------------------------------------------------------------
def _mlp_kernel(x_ref, w1_ref, b1_ref, w2_ref, b2_ref, o_ref):
    x = x_ref[...]                                                   # bf16
    h = jnp.dot(x, w1_ref[...], preferred_element_type=jnp.float32)  # f32 acc
    h = h + b1_ref[...]                                              # f32 VPU
    h = jnp.maximum(h, 0.0)                                          # f32 VPU
    y = jnp.dot(h.astype(jnp.bfloat16), w2_ref[...],
                preferred_element_type=jnp.float32)                  # f32 acc
    y = y + b2_ref[...]
    o_ref[...] = y                                                   # lane-dense f32 store


def mlp_forward(x, w1, b1, w2, b2, out_dim):
    """Batch-tiled fused MLP on lane-padded (128-multiple) parameters.

    x: (B, D) f32/bf16 (unpadded). w1/b1/w2/b2: padded, bf16 weights, f32
    biases. Returns (B, out_dim) f32.
    """
    B, D = x.shape
    Dp, Hp = w1.shape
    Op = w2.shape[1]

    # Batch tile: one full 128-row tile when the batch is large; otherwise a
    # single sublane-aligned tile.  TILE_B=128 keeps per-step VMEM tiny
    # (2 double-buffered (128,128) slabs + resident weights << 32 MiB), which
    # is safe on v5e/v6e (128 MiB) and v7x (64 MiB) alike.
    TILE_B = LANE if B >= LANE else _round_up(max(B, 1), SUBLANE)
    B_pad = _round_up(B, TILE_B)

    x_p = jnp.zeros((B_pad, Dp), jnp.bfloat16)
    x_p = x_p.at[:B, :D].set(x.astype(jnp.bfloat16))

    grid = (B_pad // TILE_B,)
    flops = 2 * B_pad * (Dp * Hp + Hp * Op)
    bytes_accessed = (x_p.size * 2 + w1.size * 2 + w2.size * 2
                      + b1.size * 4 + b2.size * 4 + B_pad * Op * 4)

    out = pl.pallas_call(
        _mlp_kernel,
        out_shape=jax.ShapeDtypeStruct((B_pad, Op), jnp.float32),
        grid_spec=pl.GridSpec(
            grid=grid,
            in_specs=[
                pl.BlockSpec((TILE_B, Dp), lambda i: (i, 0)),  # x: pipelined per tile
                pl.BlockSpec((Dp, Hp), lambda i: (0, 0)),      # W1: VMEM-resident
                pl.BlockSpec((1, Hp), lambda i: (0, 0)),       # b1: VMEM-resident
                pl.BlockSpec((Hp, Op), lambda i: (0, 0)),      # W2: VMEM-resident
                pl.BlockSpec((1, Op), lambda i: (0, 0)),       # b2: VMEM-resident
            ],
            out_specs=pl.BlockSpec((TILE_B, Op), lambda i: (i, 0)),
        ),
        compiler_params=pltpu.CompilerParams(
            dimension_semantics=("parallel",),        # batch tiles shard across TCs
            vmem_limit_bytes=32 * 1024 * 1024,        # safe on v5e/v6e/v7x
        ),
        cost_estimate=pl.CostEstimate(
            flops=flops, transcendentals=0, bytes_accessed=bytes_accessed),
    )(x_p, w1, b1, w2, b2)

    return out[:B, :out_dim]


# ---------------------------------------------------------------------------
# Inner net (deterministically initialized, lane-padded params) + DDP wrapper.
# ---------------------------------------------------------------------------
class TinyNet:
    """The module DDP wraps. Forward = fused MLP Pallas kernel."""

    def __init__(self, key, in_dim, hidden, out_dim):
        k1, k2, k3, k4 = jax.random.split(key, 4)
        self.in_dim, self.hidden, self.out_dim = in_dim, hidden, out_dim
        Dp = _round_up(in_dim, LANE)
        Hp = _round_up(hidden, LANE)
        Op = _round_up(out_dim, LANE)

        scale1 = 1.0 / jnp.sqrt(in_dim)
        scale2 = 1.0 / jnp.sqrt(hidden)
        w1 = jax.random.normal(k1, (in_dim, hidden), jnp.float32) * scale1
        b1 = jax.random.normal(k2, (1, hidden), jnp.float32) * 0.01
        w2 = jax.random.normal(k3, (hidden, out_dim), jnp.float32) * scale2
        b2 = jax.random.normal(k4, (1, out_dim), jnp.float32) * 0.01

        # Zero-padded, MXU-friendly layout: bf16 weights, f32 biases.
        self.w1 = jnp.zeros((Dp, Hp), jnp.bfloat16).at[:in_dim, :hidden].set(
            w1.astype(jnp.bfloat16))
        self.b1 = jnp.zeros((1, Hp), jnp.float32).at[:, :hidden].set(b1)
        self.w2 = jnp.zeros((Hp, Op), jnp.bfloat16).at[:hidden, :out_dim].set(
            w2.astype(jnp.bfloat16))
        self.b2 = jnp.zeros((1, Op), jnp.float32).at[:, :out_dim].set(b2)

    def __call__(self, x):
        return mlp_forward(x, self.w1, self.b1, self.w2, self.b2, self.out_dim)

    def sample(self, *args, **kwargs):
        # TODO(synk): the wrapped net's `sample` is net-specific; not part of
        # the forward pass being reproduced here.
        raise NotImplementedError


class DDP:
    """Faithful port of the PyTorch DDP wrapper's forward semantics:
    unwrap PackedTensor args, pass raw tensors through to the wrapped net."""

    def __init__(self, net):
        self.net = net

    def sample(self, *args, **kwargs):
        return self.net.sample(*args, **kwargs)

    def forward(self, *args):
        inputs = []
        for arg in args:
            if isinstance(arg, PackedTensor):
                inputs.append(arg.tensor)
            else:
                inputs.append(arg)
        return self.net(*inputs)

    __call__ = forward


if __name__ == "__main__":
    key = jax.random.PRNGKey(0)
    k_net, k_x = jax.random.split(key)

    B, IN, HID, OUT = 8, 32, 64, 16
    net = TinyNet(k_net, IN, HID, OUT)
    ddp = DDP(net)

    x = jax.random.normal(k_x, (B, IN), jnp.float32)

    # Exercise the PackedTensor-unwrapping path of DDP.forward.
    out = ddp(PackedTensor(x))
    out = jax.block_until_ready(out)
    assert out.shape == (B, OUT)

    # Pure-JAX reference of the same (bf16-operand, f32-accumulate) math on
    # the unpadded parameter views.  Zero padding contributes nothing, so the
    # kernel output must match this up to MXU/XLA accumulation-order noise.
    xb = x.astype(jnp.bfloat16)
    w1u = net.w1[:IN, :HID]
    w2u = net.w2[:HID, :OUT]
    h_ref = jnp.dot(xb, w1u, preferred_element_type=jnp.float32) + net.b1[:, :HID]
    h_ref = jnp.maximum(h_ref, 0.0)
    ref = (jnp.dot(h_ref.astype(jnp.bfloat16), w2u,
                   preferred_element_type=jnp.float32) + net.b2[:, :OUT])
    assert jnp.allclose(out, ref, atol=1e-2, rtol=1e-2)

    print("KERNEL_OK")
</pallas_src>

<mosaic_0001>
module attributes {stable_mosaic.version = 11 : i64} {
  func.func @_mlp_kernel(%arg0: i32, %arg1: memref<8x128xbf16, #tpu.memory_space<vmem>>, %arg2: memref<128x128xbf16, #tpu.memory_space<vmem>>, %arg3: memref<1x128xf32, #tpu.memory_space<vmem>>, %arg4: memref<128x128xbf16, #tpu.memory_space<vmem>>, %arg5: memref<1x128xf32, #tpu.memory_space<vmem>>, %arg6: memref<8x128xf32, #tpu.memory_space<vmem>>) attributes {dimension_semantics = [#tpu.dimension_semantics<parallel>], iteration_bounds = array<i64: 1>, scalar_prefetch = 0 : i64, scratch_operands = 0 : i64, tpu.core_type = #tpu.core_type<tc>, window_params = [{transform_indices = @transform_0, window_bounds = array<i64: 8, 128>}, {pipeline_mode = #tpu.pipeline_mode<synchronous>, transform_indices = @transform_1, window_bounds = array<i64: 128, 128>}, {pipeline_mode = #tpu.pipeline_mode<synchronous>, transform_indices = @transform_2, window_bounds = array<i64: 1, 128>}, {pipeline_mode = #tpu.pipeline_mode<synchronous>, transform_indices = @transform_3, window_bounds = array<i64: 128, 128>}, {pipeline_mode = #tpu.pipeline_mode<synchronous>, transform_indices = @transform_4, window_bounds = array<i64: 1, 128>}, {transform_indices = @transform_5, window_bounds = array<i64: 8, 128>}]} {
    %c0 = arith.constant 0 : index
    %c0_0 = arith.constant 0 : index
    %0 = vector.load %arg1[%c0, %c0_0] : memref<8x128xbf16, #tpu.memory_space<vmem>>, vector<8x128xbf16>
    %c0_1 = arith.constant 0 : index
    %c0_2 = arith.constant 0 : index
    %1 = vector.load %arg2[%c0_1, %c0_2] : memref<128x128xbf16, #tpu.memory_space<vmem>>, vector<128x128xbf16>
    %cst = arith.constant dense<0.000000e+00> : vector<8x128xf32>
    %2 = tpu.matmul %0, %1, %cst {dimension_numbers = #tpu.dot_dimension_numbers<[1], [0], [0], [1], [0, 0, 1, 1], [], []>} : vector<8x128xbf16>, vector<128x128xbf16>, vector<8x128xf32> -> vector<8x128xf32>
    %c0_3 = arith.constant 0 : index
    %c0_4 = arith.constant 0 : index
    %3 = vector.load %arg3[%c0_3, %c0_4] : memref<1x128xf32, #tpu.memory_space<vmem>>, vector<1x128xf32>
    %4 = vector.broadcast %3 : vector<1x128xf32> to vector<8x128xf32>
    %5 = arith.addf %2, %4 : vector<8x128xf32>
    %cst_5 = arith.constant 0.000000e+00 : f32
    %6 = vector.broadcast %cst_5 : f32 to vector<8x128xf32>
    %7 = arith.maximumf %5, %6 : vector<8x128xf32>
    %8 = arith.truncf %7 : vector<8x128xf32> to vector<8x128xbf16>
    %c0_6 = arith.constant 0 : index
    %c0_7 = arith.constant 0 : index
    %9 = vector.load %arg4[%c0_6, %c0_7] : memref<128x128xbf16, #tpu.memory_space<vmem>>, vector<128x128xbf16>
    %cst_8 = arith.constant dense<0.000000e+00> : vector<8x128xf32>
    %10 = tpu.matmul %8, %9, %cst_8 {dimension_numbers = #tpu.dot_dimension_numbers<[1], [0], [0], [1], [0, 0, 1, 1], [], []>} : vector<8x128xbf16>, vector<128x128xbf16>, vector<8x128xf32> -> vector<8x128xf32>
    %c0_9 = arith.constant 0 : index
    %c0_10 = arith.constant 0 : index
    %11 = vector.load %arg5[%c0_9, %c0_10] : memref<1x128xf32, #tpu.memory_space<vmem>>, vector<1x128xf32>
    %12 = vector.broadcast %11 : vector<1x128xf32> to vector<8x128xf32>
    %13 = arith.addf %10, %12 : vector<8x128xf32>
    %c0_11 = arith.constant 0 : index
    %c0_12 = arith.constant 0 : index
    %14 = vector.load %arg6[%c0_11, %c0_12] : memref<8x128xf32, #tpu.memory_space<vmem>>, vector<8x128xf32>
    tpu.vector_store %arg6[%c0_11, %c0_12], %13 {strides = array<i32>} : memref<8x128xf32, #tpu.memory_space<vmem>>, vector<8x128xf32>,
    return
  }
  func.func @transform_0(%arg0: i32) -> (i32, i32) {
    %c0_i32 = arith.constant 0 : i32
    %c0_i32_0 = arith.constant 0 : i32
    return %arg0, %c0_i32 : i32, i32
  }
  func.func @transform_1(%arg0: i32) -> (i32, i32) {
    %c0_i32 = arith.constant 0 : i32
    %c0_i32_0 = arith.constant 0 : i32
    %c0_i32_1 = arith.constant 0 : i32
    return %c0_i32, %c0_i32_0 : i32, i32
  }
  func.func @transform_2(%arg0: i32) -> (i32, i32) {
    %c0_i32 = arith.constant 0 : i32
    %c0_i32_0 = arith.constant 0 : i32
    %c0_i32_1 = arith.constant 0 : i32
    return %c0_i32, %c0_i32_0 : i32, i32
  }
  func.func @transform_3(%arg0: i32) -> (i32, i32) {
    %c0_i32 = arith.constant 0 : i32
    %c0_i32_0 = arith.constant 0 : i32
    %c0_i32_1 = arith.constant 0 : i32
    return %c0_i32, %c0_i32_0 : i32, i32
  }
  func.func @transform_4(%arg0: i32) -> (i32, i32) {
    %c0_i32 = arith.constant 0 : i32
    %c0_i32_0 = arith.constant 0 : i32
    %c0_i32_1 = arith.constant 0 : i32
    return %c0_i32, %c0_i32_0 : i32, i32
  }
  func.func @transform_5(%arg0: i32) -> (i32, i32) {
    %c0_i32 = arith.constant 0 : i32
    %c0_i32_0 = arith.constant 0 : i32
    return %arg0, %c0_i32 : i32, i32
  }
}

</mosaic_0001>

<bundles_post_ra>
// kernel: tpu_custom_call.1
= control target key start
LH: loop header
LB: loop body
LE: loop exit
PB: predicated region body
PF: predicated region fallthrough
CT: control target
= control target key end

     0   :  { %10 = vsyncpa [#allocation3], 0  ;;  %s545_s0 = inlined_call_operand.hbm [shape: bf16[8,128], index: 0, kind: input, shape index: {}]   ;;  %s546_s1 = inlined_call_operand.hbm [shape: bf16[128,128], index: 1, kind: input, shape index: {}]   ;;  %s547_s2 = inlined_call_operand.vmem [shape: f32[1,128], index: 2, kind: input, shape index: {}]   ;;  %s548_s3 = inlined_call_operand.hbm [shape: bf16[128,128], index: 3, kind: input, shape index: {}]   ;;  %s549_s4 = inlined_call_operand.vmem [shape: f32[1,128], index: 4, kind: input, shape index: {}]   ;;  %s550_s5 = inlined_call_operand.hbm [shape: f32[8,128], index: 5, kind: output, shape index: {}]  }
   0x1   :  { %11 = vsyncpa [#allocation6], 0 }
   0x2   :  { %12 = vsyncpa [#allocation4], 0  ;;  %s489_s18 = smov [#allocation5]  }
   0x3   :  { %s28_s19 = sshll.u32 %s489_s18, 4  ;;  %s29_s19 = int_to_ptr.vmem [resolvable:$true] %s28_s19 }
   0x4   :  { %s411_s20 = scalar_lea.vmem %s29_s19, 1024  ;;  %p416_p1 = scmp.lt.s32.totalorder %s29_s19, %s29_s19 }
   0x5   :  { %p412_p0 = scmp.ne.s32.totalorder %s29_s19, %s411_s20  ;;  %p417_p2 = scmp.lt.s32.totalorder %s411_s20, %s411_s20 }
   0x7   :  { %p418_p3 = por %p417_p2, %p416_p1 }
   0x9   :  { %p419_p4 = pnand %p418_p3, %p412_p0 }
   0xb   :  { %422 = shalt.err (!%p419_p4)
}
   0xc   :  { %s490_s21 = smov 64   ;;  %s491_s22 = smov 4  }
   0xd   :  { %34 = dma.hbm_to_vmem [thread:$0]  %s546_s1, 1024, %s29_s19, [#allocation6], %s490_s21, %s490_s21, %s491_s22  }
   0xe   :  { %s492_s25 = smov [#allocation2]   ;;  %s493_s27 = smov [#allocation7]  }
   0xf   :  { %s19_s26 = sshll.u32 %s492_s25, 4  ;;  %s42_s28 = sshll.u32 %s493_s27, 4  ;;  %s20_s26 = int_to_ptr.vmem [resolvable:$true] %s19_s26  ;;  %s43_s28 = int_to_ptr.vmem [resolvable:$true] %s42_s28 }
  0x10   :  { %s431_s29 = scalar_lea.vmem %s20_s26, 64  ;;  %p436_p6 = scmp.lt.s32.totalorder %s20_s26, %s20_s26 }
  0x11   :  { %p432_p5 = scmp.ne.s32.totalorder %s20_s26, %s431_s29  ;;  %p437_p7 = scmp.lt.s32.totalorder %s431_s29, %s431_s29 }
  0x13   :  { %p438_p8 = por %p437_p7, %p436_p6 }
  0x15   :  { %p439_p9 = pnand %p438_p8, %p432_p5 }
  0x17   :  { %442 = shalt.err (!%p439_p9)
}
  0x18   :  { %22 = dma.hbm_to_vmem [thread:$0]  %s545_s0, 64, %s20_s26, [#allocation3]  }
  0x19   :  { %s451_s7 = scalar_lea.vmem %s43_s28, 1024  ;;  %p456_p11 = scmp.lt.s32.totalorder %s43_s28, %s43_s28 }
  0x1a   :  { %p452_p10 = scmp.ne.s32.totalorder %s43_s28, %s451_s7  ;;  %p457_p12 = scmp.lt.s32.totalorder %s451_s7, %s451_s7 }
  0x1c   :  { %p458_p13 = por %p457_p12, %p456_p11 }
  0x1e   :  { %p459_p0 = pnand %p458_p13, %p452_p10 }
  0x20   :  { %462 = shalt.err (!%p459_p0)
}
  0x21   :  { %48 = dma.hbm_to_vmem [thread:$0]  %s548_s3, 1024, %s43_s28, [#allocation6], %s490_s21, %s490_s21, %s491_s22  }
  0x22   :  { %483 = dma.done.wait [#allocation3], 64  }
  0x23   :  { %484 = vsyncadd [#allocation3], 4294967232 }
  0x24   :  { %485 = dma.done.wait [#allocation6], 2048  }
  0x25   :  { %486 = vsyncadd [#allocation6], 4294965248  ;;  %v494_v0 = vmov 0.0   ;;  %vm495_vm0 = vmmov 0   ;;  %v387_v1 = vld [vmem:[#allocation5 + $0x38] sm:$0xff]   ;;  %v388_v2 = vld [vmem:[#allocation5 + $0x30] sm:$0xff]  }
  0x26   :  { %339 = vmatprep.subr.bf16.mxu0 %v494_v0  ;;  %355 = vmatprep.mubr.msk.bf16.mxu0 %vm495_vm0, %v494_v0  ;;  %v389_v3 = vld [vmem:[#allocation5 + $0x28] sm:$0xff]   ;;  %v395_v4 = vld [vmem:[#allocation7 + $0x38] sm:$0xff]   ;;  %v390_v5 = vld [vmem:[#allocation5 + $0x20] sm:$0xff]   ;;  %s496_s11 = smov [#allocation8]  }
  0x27   :  { %359 = vmatprep.subr.bf16.mxu1 %v494_v0  ;;  %375 = vmatprep.mubr.msk.bf16.mxu1 %vm495_vm0, %v494_v0  ;;  %v396_v6 = vld [vmem:[#allocation7 + $0x30] sm:$0xff]   ;;  %v391_v7 = vld [vmem:[#allocation5 + $0x18] sm:$0xff]   ;;  %v397_v8 = vld [vmem:[#allocation7 + $0x28] sm:$0xff]   ;;  %s293_s12 = sshll.u32 %s496_s11, 4  ;;  %s294_s12 = int_to_ptr.vmem [resolvable:$true] %s293_s12 }
  0x28   :  { %340 = vmatpush3.bf16.msra.mxu0 %v387_v1  ;;  %360 = vmatpush3.bf16.msra.mxu1 %v395_v4  ;;  %v392_v9 = vld [vmem:[#allocation5 + $0x10] sm:$0xff]   ;;  %v398_v10 = vld [vmem:[#allocation7 + $0x20] sm:$0xff]   ;;  %v393_v11 = vld [vmem:[#allocation5 + $0x8] sm:$0xff]   ;;  %p468_p2 = scmp.lt.s32.totalorder %s294_s12, %s294_s12 }
  0x29   :  { %341 = vmatprep.subr.bf16.mxu0 %v494_v0  ;;  %361 = vmatprep.subr.bf16.mxu1 %v494_v0  ;;  %v399_v12 = vld [vmem:[#allocation7 + $0x18] sm:$0xff]   ;;  %v394_v13 = vld [vmem:[#allocation5] sm:$0xff]   ;;  %v400_v14 = vld [vmem:[#allocation7 + $0x10] sm:$0xff]  }
  0x2a   :  { %v61_v15 = vld [vmem:[#allocation2] sm:$0xf]  ;;  %v401_v16 = vld [vmem:[#allocation7 + $0x8] sm:$0xff]   ;;  %v402_v17 = vld [vmem:[#allocation7] sm:$0xff]  }
  0x2b   :  { %v303_v18 = vld [vmem:[%s547_s2] ss:$0 sm:$0xff]  ;;  %s463_s2 = scalar_lea.vmem %s294_s12, 128 }
  0x2c   :  { %342 = vmatpush3.bf16.msra.mxu0 %v388_v2  ;;  %362 = vmatpush3.bf16.msra.mxu1 %v396_v6  ;;  %v312_v26 = vld [vmem:[%s549_s4] ss:$0 sm:$0xff]  ;;  %p464_p1 = scmp.ne.s32.totalorder %s294_s12, %s463_s2  ;;  %p469_p3 = scmp.lt.s32.totalorder %s463_s2, %s463_s2 }
  0x2d   :  { %343 = vmatprep.subr.bf16.mxu0 %v494_v0  ;;  %363 = vmatprep.subr.bf16.mxu1 %v494_v0 }
  0x2e   :  { %p470_p4 = por %p469_p3, %p468_p2 }
  0x30   :  { %344 = vmatpush3.bf16.msra.mxu0 %v389_v3  ;;  %364 = vmatpush3.bf16.msra.mxu1 %v397_v8  ;;  %p471_p5 = pnand %p470_p4, %p464_p1 }
  0x31   :  { %345 = vmatprep.subr.bf16.mxu0 %v494_v0  ;;  %365 = vmatprep.subr.bf16.mxu1 %v494_v0 }
  0x34   :  { %346 = vmatpush3.bf16.msra.mxu0 %v390_v5  ;;  %366 = vmatpush3.bf16.msra.mxu1 %v398_v10 }
  0x35   :  { %347 = vmatprep.subr.bf16.mxu0 %v494_v0  ;;  %367 = vmatprep.subr.bf16.mxu1 %v494_v0 }
  0x38   :  { %348 = vmatpush3.bf16.msra.mxu0 %v391_v7  ;;  %368 = vmatpush3.bf16.msra.mxu1 %v399_v12 }
  0x39   :  { %349 = vmatprep.subr.bf16.mxu0 %v494_v0  ;;  %369 = vmatprep.subr.bf16.mxu1 %v494_v0 }
  0x3c   :  { %350 = vmatpush3.bf16.msra.mxu0 %v392_v9  ;;  %370 = vmatpush3.bf16.msra.mxu1 %v400_v14 }
  0x3d   :  { %351 = vmatprep.subr.bf16.mxu0 %v494_v0  ;;  %371 = vmatprep.subr.bf16.mxu1 %v494_v0 }
  0x40   :  { %352 = vmatpush3.bf16.msra.mxu0 %v393_v11  ;;  %372 = vmatpush3.bf16.msra.mxu1 %v401_v16 }
  0x41   :  { %353 = vmatprep.subr.bf16.mxu0 %v494_v0  ;;  %373 = vmatprep.subr.bf16.mxu1 %v494_v0 }
  0x44   :  { %354 = vmatpush3.bf16.msra.mxu0 %v394_v13  ;;  %374 = vmatpush3.bf16.msra.mxu1 %v402_v17 }
  0x47   :  { %356 = vmatmul.mubr.bf16.vlgmr.msra.gmra.mxu0 %v61_v15 }
 0x107   :  { %v167_v19 = vpop.f32.mrf.mxu0 }
 0x108   :  { %v168_v20 = vadd.f32 %v303_v18, %v167_v19 }
 0x109   :  { %v357_v21 = vpop.f32.mrf.mxu0 }
 0x10a   :  { %v173_v22 = vmax.f32 %v168_v20, 0.0 }
 0x10b   :  { %v170_v23 = vpop.f32.mrf.mxu0 }
 0x10c   :  { %v174_v24 = vpack.c.bf16 %v173_v22, %v173_v22 }
 0x10d   :  { %v358_v25 = vpop.f32.mrf.mxu0 }
 0x10e   :  { %376 = vmatmul.mubr.bf16.vlgmr.msra.gmra.mxu1 %v174_v24 }
 0x1ce   :  { %v280_v27 = vpop.f32.mrf.mxu1 }
 0x1cf   :  { %v281_v28 = vadd.f32 %v312_v26, %v280_v27 }
 0x1d0   :  { %v377_v29 = vpop.f32.mrf.mxu1 }
 0x1d1   :  { %286 = vst [vmem:[#allocation8] sm:$0xff] %v281_v28 }
 0x1d2   :  { %v283_v30 = vpop.f32.mrf.mxu1 }
 0x1d3   :  { %474 = shalt.err (!%p471_p5)
}
 0x1d4   :  { %296 = dma.vmem_to_hbm [thread:$0]  %s294_s12, 128, %s550_s5, [#allocation4]   ;;  %v378_v31 = vpop.f32.mrf.mxu1 }
 0x1d5   :  { %487 = dma.done.wait [#allocation4], 128  }
 0x1d6   :  { %488 = vsyncadd [#allocation4], 4294967168 }
 0x1d7   :  { %300 = vsyncpa [#allocation3], 1 }
 0x1d8   :  { %301 = vsyncpa [#allocation6], 1 }
 0x1d9   :  { %302 = vsyncpa [#allocation4], 1 }

</bundles_post_ra>
